<compile_context>
chip_gen: v7x
topology: tpu7x:2x2x1
jax: 0.10.0
libtpu: 0.0.40
codegen_flags: <defaults>
</compile_context>

<pallas_src>
import jax
import jax.numpy as jnp
from jax.experimental import pallas as pl
from jax.experimental.pallas import tpu as pltpu


# ----------------------------------------------------------------------------
# Helpers
# ----------------------------------------------------------------------------
def interp_matrix(in_size, out_size):
    """(out_size, in_size) matrix M such that M @ v is the 1-D bilinear resize
    of v matching nn.Upsample(mode='bilinear', align_corners=True)."""
    if in_size == 1:
        return jnp.ones((out_size, 1), jnp.float32)
    pos = (jnp.arange(out_size, dtype=jnp.float32) * (in_size - 1)
           / (out_size - 1))
    lo = jnp.clip(jnp.floor(pos).astype(jnp.int32), 0, in_size - 2)
    frac = pos - lo.astype(jnp.float32)
    rows = jnp.arange(out_size)
    m = jnp.zeros((out_size, in_size), jnp.float32)
    m = m.at[rows, lo].add(1.0 - frac).at[rows, lo + 1].add(frac)
    return m


def fold_bn(conv_bias, gamma, beta, running_mean, running_var, eps=1e-5):
    # TODO(synk): BatchNorm is eval-mode only (running stats folded into a
    # per-channel scale/bias); training-mode batch statistics of
    # nn.BatchNorm2d are not reproduced.
    scale = gamma / jnp.sqrt(running_var + eps)
    bias = beta + scale * (conv_bias - running_mean)
    return scale, bias


def _round_up(x, m):
    return ((x + m - 1) // m) * m


# ----------------------------------------------------------------------------
# Fused UNetUpBlock forward (NCHW in / NCHW out)
# ----------------------------------------------------------------------------
def unet_up_block_forward(params, x1_nchw, x2_nchw, eps=1e-5):
    N, C1, H1, W1 = x1_nchw.shape
    N2, C2, H, W = x2_nchw.shape
    assert N == N2 and H == 2 * H1 and W == 2 * W1
    Cin = C1 + C2
    Cout = params["w1"].shape[0]
    CMAX = max(Cin, Cout)
    HW = H * W
    H1W1 = H1 * W1
    PAD = W + 1                        # largest 3x3 tap shift is +-(W+1)
    LM = _round_up(PAD, 128)           # interior starts at a 128-aligned lane
    BUF = LM + HW + LM

    # ---- host-side prep (tiny, constant-per-call) --------------------------
    uh = interp_matrix(H1, H)                      # (H,  H1) f32
    uw = interp_matrix(W1, W)                      # (W,  W1) f32
    # Combined separable upsample matrix: x1u_flat = x1_flat @ upT.
    # TODO(synk): for large H1*W1 switch to the separable two-matmul path
    # (dot_general with a real batch dim) instead of the dense kron matrix.
    upT = jnp.kron(uh, uw).T.astype(jnp.float32)   # (H1*W1, H*W)

    def conv_w2d(w):
        # (Cout, Ci, 3, 3) -> (Cout, 9*Ci), tap-major K matching im2col rows.
        co, ci = w.shape[0], w.shape[1]
        return (jnp.transpose(w, (0, 2, 3, 1))
                .reshape(co, 9 * ci).astype(jnp.bfloat16))

    w1 = conv_w2d(params["w1"])                    # (Cout, 9*Cin)  bf16
    w2 = conv_w2d(params["w2"])                    # (Cout, 9*Cout) bf16
    s1, b1 = fold_bn(params["cb1"], params["g1"], params["be1"],
                     params["m1"], params["v1"], eps)
    s2, b2 = fold_bn(params["cb2"], params["g2"], params["be2"],
                     params["m2"], params["v2"], eps)
    s1 = s1.reshape(Cout, 1).astype(jnp.float32)
    b1 = b1.reshape(Cout, 1).astype(jnp.float32)
    s2 = s2.reshape(Cout, 1).astype(jnp.float32)
    b2 = b2.reshape(Cout, 1).astype(jnp.float32)

    # Lane-dense, metadata-only flattening of the activations.
    x1_flat = x1_nchw.reshape(N, C1, H1W1).astype(jnp.float32)
    x2_flat = x2_nchw.reshape(N, C2, HW).astype(jnp.bfloat16)

    def kernel(x1_ref, x2_ref, up_ref, w1_ref, s1_ref, b1_ref,
               w2_ref, s2_ref, b2_ref, o_ref, mbuf, cbuf):
        # Column-edge masks, generated in-kernel (cheap VPU iota, no HBM I/O).
        col = jax.lax.broadcasted_iota(jnp.int32, (1, HW), 1) % W
        not_left = col != 0            # output col 0 has no x-1 source
        not_right = col != (W - 1)     # output col W-1 has no x+1 source

        # Zero only the margin strips the 3x3 taps actually read.  Done every
        # grid step (scratch is per-core under megacore "parallel" sharding,
        # so a program_id==0 guard would be unsafe); the interior is fully
        # overwritten each step.
        zstrip = jnp.zeros((CMAX, PAD), mbuf.dtype)
        mbuf[:, LM - PAD:LM] = zstrip
        mbuf[:, LM + HW:LM + HW + PAD] = zstrip

        # ---- bilinear x2 upsample (align_corners=True): ONE matmul ---------
        x1u = jnp.dot(x1_ref[0], up_ref[...],
                      preferred_element_type=jnp.float32)       # (C1, HW) f32

        # ---- concat([up(x1), x2]) into the margin-buffer interior ----------
        mbuf[0:C1, LM:LM + HW] = x1u.astype(mbuf.dtype)
        mbuf[C1:Cin, LM:LM + HW] = x2_ref[0]

        def conv3x3_bn_relu(cin, w_ref, s_ref, b_ref):
            # im2col: 9 shifted slices stacked along K, boundary masks baked
            # into the bf16 staging buffer.
            for dy in range(3):
                for dx in range(3):
                    tap = dy * 3 + dx
                    lo = LM + (dy - 1) * W + (dx - 1)
                    sl = mbuf[0:cin, lo:lo + HW]
                    if dx == 0:
                        sl = jnp.where(not_left, sl, 0)
                    elif dx == 2:
                        sl = jnp.where(not_right, sl, 0)
                    cbuf[tap * cin:(tap + 1) * cin, :] = sl
            # ONE large-K MXU matmul per conv: (Cout, 9*cin) @ (9*cin, HW).
            acc = jnp.dot(w_ref[...], cbuf[0:9 * cin, :],
                          preferred_element_type=jnp.float32)
            return jnp.maximum(acc * s_ref[...] + b_ref[...], 0.0)

        # ---- conv1 + BN + ReLU ---------------------------------------------
        h = conv3x3_bn_relu(Cin, w1_ref, s1_ref, b1_ref)
        # Reuse the margin buffer's first Cout rows for h (margins stay zero).
        mbuf[0:Cout, LM:LM + HW] = h.astype(mbuf.dtype)

        # ---- conv2 + BN + ReLU (h never leaves VMEM) -------------------------
        y = conv3x3_bn_relu(Cout, w2_ref, s2_ref, b2_ref)
        o_ref[0] = y.astype(o_ref.dtype)           # lane-dense (Cout, HW) store

    # TODO(synk): for production H/W add a second "parallel" row-block grid
    # axis with a 2-row halo through the two fused convs (deeper DMA
    # pipelining, megacore balance at small N, fits v7x's 64 MiB VMEM), and
    # re-sweep tile sizes / vmem_limit_bytes per TPU generation.
    out_flat = pl.pallas_call(
        kernel,
        out_shape=jax.ShapeDtypeStruct((N, Cout, HW), x2_nchw.dtype),
        grid=(N,),
        in_specs=[
            pl.BlockSpec((1, C1, H1W1), lambda n: (n, 0, 0)),    # x1 (flat)
            pl.BlockSpec((1, C2, HW), lambda n: (n, 0, 0)),      # x2 (flat)
            pl.BlockSpec((H1W1, HW), lambda n: (0, 0)),          # upsample mat
            pl.BlockSpec((Cout, 9 * Cin), lambda n: (0, 0)),     # w1 (im2col K)
            pl.BlockSpec((Cout, 1), lambda n: (0, 0)),           # s1
            pl.BlockSpec((Cout, 1), lambda n: (0, 0)),           # b1
            pl.BlockSpec((Cout, 9 * Cout), lambda n: (0, 0)),    # w2 (im2col K)
            pl.BlockSpec((Cout, 1), lambda n: (0, 0)),           # s2
            pl.BlockSpec((Cout, 1), lambda n: (0, 0)),           # b2
        ],
        out_specs=pl.BlockSpec((1, Cout, HW), lambda n: (n, 0, 0)),
        scratch_shapes=[
            pltpu.VMEM((CMAX, BUF), jnp.bfloat16),     # margin buffer (x / h)
            pltpu.VMEM((9 * CMAX, HW), jnp.bfloat16),  # im2col staging buffer
        ],
        compiler_params=pltpu.CompilerParams(
            dimension_semantics=("parallel",)),
    )(x1_flat, x2_flat, upT, w1, s1, b1, w2, s2, b2)

    # (N, Cout, H*W) -> NCHW via a pure metadata reshape (no transpose).
    return out_flat.reshape(N, Cout, H, W)


# ----------------------------------------------------------------------------
# Pure-JAX reference (exact module semantics; conv_dtype=bfloat16 mimics the
# kernel's MXU input rounding with f32 accumulation)
# ----------------------------------------------------------------------------
def ref_forward(params, x1_nchw, x2_nchw, conv_dtype=jnp.float32, eps=1e-5):
    _, _, H1, W1 = x1_nchw.shape
    _, _, H, W = x2_nchw.shape
    uh = interp_matrix(H1, H)                        # (H, H1)
    uw = interp_matrix(W1, W)                        # (W, W1)
    x1u = jnp.einsum("ah,nchw,bw->ncab", uh,
                     x1_nchw.astype(jnp.float32), uw)
    x = jnp.concatenate([x1u, x2_nchw.astype(jnp.float32)], axis=1)

    def conv_bn_relu(x, w, cb, g, be, m, v):
        s, b = fold_bn(cb, g, be, m, v, eps)
        y = jax.lax.conv_general_dilated(
            x.astype(conv_dtype), w.astype(conv_dtype),
            window_strides=(1, 1), padding=((1, 1), (1, 1)),
            dimension_numbers=("NCHW", "OIHW", "NCHW"),
            preferred_element_type=jnp.float32)
        return jnp.maximum(y * s[None, :, None, None]
                           + b[None, :, None, None], 0.0)

    h = conv_bn_relu(x, params["w1"], params["cb1"], params["g1"],
                     params["be1"], params["m1"], params["v1"])
    return conv_bn_relu(h, params["w2"], params["cb2"], params["g2"],
                        params["be2"], params["m2"], params["v2"])


# ----------------------------------------------------------------------------
# Deterministic parameter init + driver
# ----------------------------------------------------------------------------
def make_params(key, in_channels, out_channels):
    ks = jax.random.split(key, 12)
    Ci, Co = in_channels, out_channels
    return {
        "w1": 0.1 * jax.random.normal(ks[0], (Co, Ci, 3, 3), jnp.float32),
        "cb1": 0.1 * jax.random.normal(ks[1], (Co,), jnp.float32),
        "g1": 1.0 + 0.1 * jax.random.normal(ks[2], (Co,), jnp.float32),
        "be1": 0.1 * jax.random.normal(ks[3], (Co,), jnp.float32),
        "m1": 0.1 * jax.random.normal(ks[4], (Co,), jnp.float32),
        "v1": jax.random.uniform(ks[5], (Co,), jnp.float32, 0.5, 1.5),
        "w2": 0.1 * jax.random.normal(ks[6], (Co, Co, 3, 3), jnp.float32),
        "cb2": 0.1 * jax.random.normal(ks[7], (Co,), jnp.float32),
        "g2": 1.0 + 0.1 * jax.random.normal(ks[8], (Co,), jnp.float32),
        "be2": 0.1 * jax.random.normal(ks[9], (Co,), jnp.float32),
        "m2": 0.1 * jax.random.normal(ks[10], (Co,), jnp.float32),
        "v2": jax.random.uniform(ks[11], (Co,), jnp.float32, 0.5, 1.5),
    }


if __name__ == "__main__":
    key = jax.random.PRNGKey(0)
    k1, k2, kp = jax.random.split(key, 3)
    # x1: coarse feature map, x2: skip connection (conv in_channels = 4+4 = 8).
    x1 = jax.random.normal(k1, (2, 4, 8, 8), jnp.float32)     # NCHW
    x2 = jax.random.normal(k2, (2, 4, 16, 16), jnp.float32)   # NCHW
    params = make_params(kp, in_channels=8, out_channels=4)

    fwd = jax.jit(unet_up_block_forward)
    out = jax.block_until_ready(fwd(params, x1, x2))
    assert out.shape == (2, 4, 16, 16), out.shape

    # Structural check vs. a reference that rounds MXU inputs to bf16 like the
    # kernel does (remaining gap = f32 accumulation-order / 1-ulp cast flips).
    ref_bf16 = jax.block_until_ready(
        ref_forward(params, x1, x2, conv_dtype=jnp.bfloat16))
    err_bf16 = float(jnp.max(jnp.abs(out - ref_bf16)))
    assert err_bf16 < 3e-2, err_bf16

    # Semantic check vs. the exact f32 module math (bf16 MXU error budget).
    ref_f32 = jax.block_until_ready(
        ref_forward(params, x1, x2, conv_dtype=jnp.float32))
    err_f32 = float(jnp.max(jnp.abs(out - ref_f32)))
    assert err_f32 < 6e-2, err_f32

    print("KERNEL_OK")
</pallas_src>

<mosaic_0001>
module attributes {stable_mosaic.version = 11 : i64} {
  func.func private @main(%arg0: i32) attributes {dimension_semantics = [#tpu.dimension_semantics<core_parallel>], iteration_bounds = array<i64: 2>, tpu.core_type = #tpu.core_type<sc_scalar_subcore>, window_params = []} {
    return
  }
}

module attributes {stable_mosaic.version = 11 : i64} {
  func.func private @main(%arg0: i32) attributes {dimension_semantics = [#tpu.dimension_semantics<core_parallel>], iteration_bounds = array<i64: 2>, tpu.core_type = #tpu.core_type<sc_scalar_subcore>, window_params = []} {
    return
  }
}

module attributes {stable_mosaic.version = 11 : i64} {
  func.func @kernel(%arg0: i32, %arg1: memref<1x4x64xf32, #tpu.memory_space<vmem>>, %arg2: memref<1x4x256xbf16, #tpu.memory_space<vmem>>, %arg3: memref<64x256xf32, #tpu.memory_space<vmem>>, %arg4: memref<4x72xbf16, #tpu.memory_space<vmem>>, %arg5: memref<4x1xf32, #tpu.memory_space<vmem>>, %arg6: memref<4x1xf32, #tpu.memory_space<vmem>>, %arg7: memref<4x36xbf16, #tpu.memory_space<vmem>>, %arg8: memref<4x1xf32, #tpu.memory_space<vmem>>, %arg9: memref<4x1xf32, #tpu.memory_space<vmem>>, %arg10: memref<1x4x256xf32, #tpu.memory_space<vmem>>, %arg11: memref<8x512xbf16, #tpu.memory_space<vmem>>, %arg12: memref<72x256xbf16, #tpu.memory_space<vmem>>) attributes {dimension_semantics = [#tpu.dimension_semantics<parallel>], iteration_bounds = array<i64: 2>, scalar_prefetch = 0 : i64, scratch_operands = 2 : i64, tpu.core_type = #tpu.core_type<tc>, window_params = [{transform_indices = @transform_0, window_bounds = array<i64: 1, 4, 64>}, {transform_indices = @transform_1, window_bounds = array<i64: 1, 4, 256>}, {pipeline_mode = #tpu.pipeline_mode<synchronous>, transform_indices = @transform_2, window_bounds = array<i64: 64, 256>}, {pipeline_mode = #tpu.pipeline_mode<synchronous>, transform_indices = @transform_3, window_bounds = array<i64: 4, 72>}, {pipeline_mode = #tpu.pipeline_mode<synchronous>, transform_indices = @transform_4, window_bounds = array<i64: 4, 1>}, {pipeline_mode = #tpu.pipeline_mode<synchronous>, transform_indices = @transform_5, window_bounds = array<i64: 4, 1>}, {pipeline_mode = #tpu.pipeline_mode<synchronous>, transform_indices = @transform_6, window_bounds = array<i64: 4, 36>}, {pipeline_mode = #tpu.pipeline_mode<synchronous>, transform_indices = @transform_7, window_bounds = array<i64: 4, 1>}, {pipeline_mode = #tpu.pipeline_mode<synchronous>, transform_indices = @transform_8, window_bounds = array<i64: 4, 1>}, {transform_indices = @transform_9, window_bounds = array<i64: 1, 4, 256>}]} {
    %0 = tpu.iota {dimensions = array<i32: 1>} : vector<1x256xi32>
    %c16_i32 = arith.constant 16 : i32
    %c0_i32 = arith.constant 0 : i32
    %1 = arith.cmpi eq, %c16_i32, %c0_i32 : i32
    %c1_i32 = arith.constant 1 : i32
    %2 = arith.select %1, %c1_i32, %c16_i32 : i32
    %3 = vector.broadcast %2 : i32 to vector<1x256xi32>
    %4 = arith.remsi %0, %3 : vector<1x256xi32>
    %c0_i32_0 = arith.constant 0 : i32
    %5 = vector.broadcast %c0_i32_0 : i32 to vector<1x256xi32>
    %6 = arith.cmpi ne, %4, %5 : vector<1x256xi32>
    %c0_i32_1 = arith.constant 0 : i32
    %7 = vector.broadcast %c0_i32_1 : i32 to vector<1x256xi32>
    %8 = arith.cmpi slt, %4, %7 : vector<1x256xi32>
    %c0_i32_2 = arith.constant 0 : i32
    %9 = arith.cmpi slt, %2, %c0_i32_2 : i32
    %10 = vector.broadcast %9 : i1 to vector<1x256xi1>
    %11 = vector.broadcast %10 : vector<1x256xi1> to vector<1x256xi1>
    %12 = arith.xori %8, %11 : vector<1x256xi1>
    %13 = arith.andi %12, %6 : vector<1x256xi1>
    %14 = vector.broadcast %2 : i32 to vector<1x256xi32>
    %15 = arith.addi %4, %14 : vector<1x256xi32>
    %16 = arith.select %13, %15, %4 : vector<1x256xi1>, vector<1x256xi32>
    %c0_i32_3 = arith.constant 0 : i32
    %17 = vector.broadcast %c0_i32_3 : i32 to vector<1x256xi32>
    %18 = arith.cmpi ne, %16, %17 : vector<1x256xi32>
    %c15_i32 = arith.constant 15 : i32
    %19 = vector.broadcast %c15_i32 : i32 to vector<1x256xi32>
    %20 = arith.cmpi ne, %16, %19 : vector<1x256xi32>
    %cst = arith.constant 0.000000e+00 : bf16
    %21 = vector.broadcast %cst : bf16 to vector<8x17xbf16>
    %c0 = arith.constant 0 : index
    %c111 = arith.constant 111 : index
    %22 = vector.load %arg11[%c0, %c111] : memref<8x512xbf16, #tpu.memory_space<vmem>>, vector<8x17xbf16>
    tpu.vector_store %arg11[%c0, %c111], %21 {strides = array<i32>} : memref<8x512xbf16, #tpu.memory_space<vmem>>, vector<8x17xbf16>,
    %c0_4 = arith.constant 0 : index
    %c384 = arith.constant 384 : index
    %23 = vector.load %arg11[%c0_4, %c384] : memref<8x512xbf16, #tpu.memory_space<vmem>>, vector<8x17xbf16>
    tpu.vector_store %arg11[%c0_4, %c384], %21 {strides = array<i32>} : memref<8x512xbf16, #tpu.memory_space<vmem>>, vector<8x17xbf16>,
    %c0_5 = arith.constant 0 : index
    %c0_6 = arith.constant 0 : index
    %c0_7 = arith.constant 0 : index
    %24 = vector.load %arg1[%c0_5, %c0_6, %c0_7] : memref<1x4x64xf32, #tpu.memory_space<vmem>>, vector<1x4x64xf32>
    %25 = vector.shape_cast %24 : vector<1x4x64xf32> to vector<4x64xf32>
    %c0_8 = arith.constant 0 : index
    %c0_9 = arith.constant 0 : index
    %26 = vector.load %arg3[%c0_8, %c0_9] : memref<64x256xf32, #tpu.memory_space<vmem>>, vector<64x256xf32>
    %cst_10 = arith.constant dense<0.000000e+00> : vector<4x256xf32>
    %27 = tpu.matmul %25, %26, %cst_10 {dimension_numbers = #tpu.dot_dimension_numbers<[1], [0], [0], [1], [0, 0, 1, 1], [], []>} : vector<4x64xf32>, vector<64x256xf32>, vector<4x256xf32> -> vector<4x256xf32>
    %28 = arith.truncf %27 : vector<4x256xf32> to vector<4x256xbf16>
    %c0_11 = arith.constant 0 : index
    %c128 = arith.constant 128 : index
    %29 = vector.load %arg11[%c0_11, %c128] : memref<8x512xbf16, #tpu.memory_space<vmem>>, vector<4x256xbf16>
    tpu.vector_store %arg11[%c0_11, %c128], %28 {strides = array<i32>} : memref<8x512xbf16, #tpu.memory_space<vmem>>, vector<4x256xbf16>,
    %c0_12 = arith.constant 0 : index
    %c0_13 = arith.constant 0 : index
    %c0_14 = arith.constant 0 : index
    %30 = vector.load %arg2[%c0_12, %c0_13, %c0_14] : memref<1x4x256xbf16, #tpu.memory_space<vmem>>, vector<1x4x256xbf16>
    %31 = vector.shape_cast %30 : vector<1x4x256xbf16> to vector<4x256xbf16>
    %c4 = arith.constant 4 : index
    %c128_15 = arith.constant 128 : index
    %32 = vector.load %arg11[%c4, %c128_15] : memref<8x512xbf16, #tpu.memory_space<vmem>>, vector<4x256xbf16>
    tpu.vector_store %arg11[%c4, %c128_15], %31 {strides = array<i32>} : memref<8x512xbf16, #tpu.memory_space<vmem>>, vector<4x256xbf16>,
    %c0_16 = arith.constant 0 : index
    %c111_17 = arith.constant 111 : index
    %33 = vector.load %arg11[%c0_16, %c111_17] : memref<8x512xbf16, #tpu.memory_space<vmem>>, vector<8x256xbf16>
    %c0_i32_18 = arith.constant 0 : i32
    %34 = arith.sitofp %c0_i32_18 : i32 to bf16
    %35 = vector.shape_cast %18 : vector<1x256xi1> to vector<1x256xi1>
    %36 = vector.broadcast %35 : vector<1x256xi1> to vector<8x256xi1>
    %37 = vector.broadcast %34 : bf16 to vector<8x256xbf16>
    %38 = arith.select %36, %33, %37 : vector<8x256xi1>, vector<8x256xbf16>
    %c0_19 = arith.constant 0 : index
    %c0_20 = arith.constant 0 : index
    %39 = vector.load %arg12[%c0_19, %c0_20] : memref<72x256xbf16, #tpu.memory_space<vmem>>, vector<8x256xbf16>
    tpu.vector_store %arg12[%c0_19, %c0_20], %38 {strides = array<i32>} : memref<72x256xbf16, #tpu.memory_space<vmem>>, vector<8x256xbf16>,
    %c0_21 = arith.constant 0 : index
    %c112 = arith.constant 112 : index
    %40 = vector.load %arg11[%c0_21, %c112] : memref<8x512xbf16, #tpu.memory_space<vmem>>, vector<8x256xbf16>
    %c8 = arith.constant 8 : index
    %c0_22 = arith.constant 0 : index
    %41 = vector.load %arg12[%c8, %c0_22] : memref<72x256xbf16, #tpu.memory_space<vmem>>, vector<8x256xbf16>
    tpu.vector_store %arg12[%c8, %c0_22], %40 {strides = array<i32>} : memref<72x256xbf16, #tpu.memory_space<vmem>>, vector<8x256xbf16>,
    %c0_23 = arith.constant 0 : index
    %c113 = arith.constant 113 : index
    %42 = vector.load %arg11[%c0_23, %c113] : memref<8x512xbf16, #tpu.memory_space<vmem>>, vector<8x256xbf16>
    %c0_i32_24 = arith.constant 0 : i32
    %43 = arith.sitofp %c0_i32_24 : i32 to bf16
    %44 = vector.shape_cast %20 : vector<1x256xi1> to vector<1x256xi1>
    %45 = vector.broadcast %44 : vector<1x256xi1> to vector<8x256xi1>
    %46 = vector.broadcast %43 : bf16 to vector<8x256xbf16>
    %47 = arith.select %45, %42, %46 : vector<8x256xi1>, vector<8x256xbf16>
    %c16 = arith.constant 16 : index
    %c0_25 = arith.constant 0 : index
    %48 = vector.load %arg12[%c16, %c0_25] : memref<72x256xbf16, #tpu.memory_space<vmem>>, vector<8x256xbf16>
    tpu.vector_store %arg12[%c16, %c0_25], %47 {strides = array<i32>} : memref<72x256xbf16, #tpu.memory_space<vmem>>, vector<8x256xbf16>,
    %c0_26 = arith.constant 0 : index
    %c127 = arith.constant 127 : index
    %49 = vector.load %arg11[%c0_26, %c127] : memref<8x512xbf16, #tpu.memory_space<vmem>>, vector<8x256xbf16>
    %c0_i32_27 = arith.constant 0 : i32
    %50 = arith.sitofp %c0_i32_27 : i32 to bf16
    %51 = vector.shape_cast %18 : vector<1x256xi1> to vector<1x256xi1>
    %52 = vector.broadcast %51 : vector<1x256xi1> to vector<8x256xi1>
    %53 = vector.broadcast %50 : bf16 to vector<8x256xbf16>
    %54 = arith.select %52, %49, %53 : vector<8x256xi1>, vector<8x256xbf16>
    %c24 = arith.constant 24 : index
    %c0_28 = arith.constant 0 : index
    %55 = vector.load %arg12[%c24, %c0_28] : memref<72x256xbf16, #tpu.memory_space<vmem>>, vector<8x256xbf16>
    tpu.vector_store %arg12[%c24, %c0_28], %54 {strides = array<i32>} : memref<72x256xbf16, #tpu.memory_space<vmem>>, vector<8x256xbf16>,
    %c0_29 = arith.constant 0 : index
    %c128_30 = arith.constant 128 : index
    %56 = vector.load %arg11[%c0_29, %c128_30] : memref<8x512xbf16, #tpu.memory_space<vmem>>, vector<8x256xbf16>
    %c32 = arith.constant 32 : index
    %c0_31 = arith.constant 0 : index
    %57 = vector.load %arg12[%c32, %c0_31] : memref<72x256xbf16, #tpu.memory_space<vmem>>, vector<8x256xbf16>
    tpu.vector_store %arg12[%c32, %c0_31], %56 {strides = array<i32>} : memref<72x256xbf16, #tpu.memory_space<vmem>>, vector<8x256xbf16>,
    %c0_32 = arith.constant 0 : index
    %c129 = arith.constant 129 : index
    %58 = vector.load %arg11[%c0_32, %c129] : memref<8x512xbf16, #tpu.memory_space<vmem>>, vector<8x256xbf16>
    %c0_i32_33 = arith.constant 0 : i32
    %59 = arith.sitofp %c0_i32_33 : i32 to bf16
    %60 = vector.shape_cast %20 : vector<1x256xi1> to vector<1x256xi1>
    %61 = vector.broadcast %60 : vector<1x256xi1> to vector<8x256xi1>
    %62 = vector.broadcast %59 : bf16 to vector<8x256xbf16>
    %63 = arith.select %61, %58, %62 : vector<8x256xi1>, vector<8x256xbf16>
    %c40 = arith.constant 40 : index
    %c0_34 = arith.constant 0 : index
    %64 = vector.load %arg12[%c40, %c0_34] : memref<72x256xbf16, #tpu.memory_space<vmem>>, vector<8x256xbf16>
    tpu.vector_store %arg12[%c40, %c0_34], %63 {strides = array<i32>} : memref<72x256xbf16, #tpu.memory_space<vmem>>, vector<8x256xbf16>,
    %c0_35 = arith.constant 0 : index
    %c143 = arith.constant 143 : index
    %65 = vector.load %arg11[%c0_35, %c143] : memref<8x512xbf16, #tpu.memory_space<vmem>>, vector<8x256xbf16>
    %c0_i32_36 = arith.constant 0 : i32
    %66 = arith.sitofp %c0_i32_36 : i32 to bf16
    %67 = vector.shape_cast %18 : vector<1x256xi1> to vector<1x256xi1>
    %68 = vector.broadcast %67 : vector<1x256xi1> to vector<8x256xi1>
    %69 = vector.broadcast %66 : bf16 to vector<8x256xbf16>
    %70 = arith.select %68, %65, %69 : vector<8x256xi1>, vector<8x256xbf16>
    %c48 = arith.constant 48 : index
    %c0_37 = arith.constant 0 : index
    %71 = vector.load %arg12[%c48, %c0_37] : memref<72x256xbf16, #tpu.memory_space<vmem>>, vector<8x256xbf16>
    tpu.vector_store %arg12[%c48, %c0_37], %70 {strides = array<i32>} : memref<72x256xbf16, #tpu.memory_space<vmem>>, vector<8x256xbf16>,
    %c0_38 = arith.constant 0 : index
    %c144 = arith.constant 144 : index
    %72 = vector.load %arg11[%c0_38, %c144] : memref<8x512xbf16, #tpu.memory_space<vmem>>, vector<8x256xbf16>
    %c56 = arith.constant 56 : index
    %c0_39 = arith.constant 0 : index
    %73 = vector.load %arg12[%c56, %c0_39] : memref<72x256xbf16, #tpu.memory_space<vmem>>, vector<8x256xbf16>
    tpu.vector_store %arg12[%c56, %c0_39], %72 {strides = array<i32>} : memref<72x256xbf16, #tpu.memory_space<vmem>>, vector<8x256xbf16>,
    %c0_40 = arith.constant 0 : index
    %c145 = arith.constant 145 : index
    %74 = vector.load %arg11[%c0_40, %c145] : memref<8x512xbf16, #tpu.memory_space<vmem>>, vector<8x256xbf16>
    %c0_i32_41 = arith.constant 0 : i32
    %75 = arith.sitofp %c0_i32_41 : i32 to bf16
    %76 = vector.shape_cast %20 : vector<1x256xi1> to vector<1x256xi1>
    %77 = vector.broadcast %76 : vector<1x256xi1> to vector<8x256xi1>
    %78 = vector.broadcast %75 : bf16 to vector<8x256xbf16>
    %79 = arith.select %77, %74, %78 : vector<8x256xi1>, vector<8x256xbf16>
    %c64 = arith.constant 64 : index
    %c0_42 = arith.constant 0 : index
    %80 = vector.load %arg12[%c64, %c0_42] : memref<72x256xbf16, #tpu.memory_space<vmem>>, vector<8x256xbf16>
    tpu.vector_store %arg12[%c64, %c0_42], %79 {strides = array<i32>} : memref<72x256xbf16, #tpu.memory_space<vmem>>, vector<8x256xbf16>,
    %c0_43 = arith.constant 0 : index
    %c0_44 = arith.constant 0 : index
    %81 = vector.load %arg4[%c0_43, %c0_44] : memref<4x72xbf16, #tpu.memory_space<vmem>>, vector<4x72xbf16>
    %c0_45 = arith.constant 0 : index
    %c0_46 = arith.constant 0 : index
    %82 = vector.load %arg12[%c0_45, %c0_46] : memref<72x256xbf16, #tpu.memory_space<vmem>>, vector<72x256xbf16>
    %cst_47 = arith.constant dense<0.000000e+00> : vector<4x256xf32>
    %83 = tpu.matmul %81, %82, %cst_47 {dimension_numbers = #tpu.dot_dimension_numbers<[1], [0], [0], [1], [0, 0, 1, 1], [], []>} : vector<4x72xbf16>, vector<72x256xbf16>, vector<4x256xf32> -> vector<4x256xf32>
    %c0_48 = arith.constant 0 : index
    %c0_49 = arith.constant 0 : index
    %84 = vector.load %arg5[%c0_48, %c0_49] : memref<4x1xf32, #tpu.memory_space<vmem>>, vector<4x1xf32>
    %85 = vector.broadcast %84 : vector<4x1xf32> to vector<4x256xf32>
    %86 = arith.mulf %83, %85 : vector<4x256xf32>
    %c0_50 = arith.constant 0 : index
    %c0_51 = arith.constant 0 : index
    %87 = vector.load %arg6[%c0_50, %c0_51] : memref<4x1xf32, #tpu.memory_space<vmem>>, vector<4x1xf32>
    %88 = vector.broadcast %87 : vector<4x1xf32> to vector<4x256xf32>
    %89 = arith.addf %86, %88 : vector<4x256xf32>
    %cst_52 = arith.constant 0.000000e+00 : f32
    %90 = vector.broadcast %cst_52 : f32 to vector<4x256xf32>
    %91 = arith.maximumf %89, %90 : vector<4x256xf32>
    %92 = arith.truncf %91 : vector<4x256xf32> to vector<4x256xbf16>
    %c0_53 = arith.constant 0 : index
    %c128_54 = arith.constant 128 : index
    %93 = vector.load %arg11[%c0_53, %c128_54] : memref<8x512xbf16, #tpu.memory_space<vmem>>, vector<4x256xbf16>
    tpu.vector_store %arg11[%c0_53, %c128_54], %92 {strides = array<i32>} : memref<8x512xbf16, #tpu.memory_space<vmem>>, vector<4x256xbf16>,
    %c0_55 = arith.constant 0 : index
    %c111_56 = arith.constant 111 : index
    %94 = vector.load %arg11[%c0_55, %c111_56] : memref<8x512xbf16, #tpu.memory_space<vmem>>, vector<4x256xbf16>
    %c0_i32_57 = arith.constant 0 : i32
    %95 = arith.sitofp %c0_i32_57 : i32 to bf16
    %96 = vector.shape_cast %18 : vector<1x256xi1> to vector<1x256xi1>
    %97 = vector.broadcast %96 : vector<1x256xi1> to vector<4x256xi1>
    %98 = vector.broadcast %95 : bf16 to vector<4x256xbf16>
    %99 = arith.select %97, %94, %98 : vector<4x256xi1>, vector<4x256xbf16>
    %c0_58 = arith.constant 0 : index
    %c0_59 = arith.constant 0 : index
    %100 = vector.load %arg12[%c0_58, %c0_59] : memref<72x256xbf16, #tpu.memory_space<vmem>>, vector<4x256xbf16>
    tpu.vector_store %arg12[%c0_58, %c0_59], %99 {strides = array<i32>} : memref<72x256xbf16, #tpu.memory_space<vmem>>, vector<4x256xbf16>,
    %c0_60 = arith.constant 0 : index
    %c112_61 = arith.constant 112 : index
    %101 = vector.load %arg11[%c0_60, %c112_61] : memref<8x512xbf16, #tpu.memory_space<vmem>>, vector<4x256xbf16>
    %c4_62 = arith.constant 4 : index
    %c0_63 = arith.constant 0 : index
    %102 = vector.load %arg12[%c4_62, %c0_63] : memref<72x256xbf16, #tpu.memory_space<vmem>>, vector<4x256xbf16>
    tpu.vector_store %arg12[%c4_62, %c0_63], %101 {strides = array<i32>} : memref<72x256xbf16, #tpu.memory_space<vmem>>, vector<4x256xbf16>,
    %c0_64 = arith.constant 0 : index
    %c113_65 = arith.constant 113 : index
    %103 = vector.load %arg11[%c0_64, %c113_65] : memref<8x512xbf16, #tpu.memory_space<vmem>>, vector<4x256xbf16>
    %c0_i32_66 = arith.constant 0 : i32
    %104 = arith.sitofp %c0_i32_66 : i32 to bf16
    %105 = vector.shape_cast %20 : vector<1x256xi1> to vector<1x256xi1>
    %106 = vector.broadcast %105 : vector<1x256xi1> to vector<4x256xi1>
    %107 = vector.broadcast %104 : bf16 to vector<4x256xbf16>
    %108 = arith.select %106, %103, %107 : vector<4x256xi1>, vector<4x256xbf16>
    %c8_67 = arith.constant 8 : index
    %c0_68 = arith.constant 0 : index
    %109 = vector.load %arg12[%c8_67, %c0_68] : memref<72x256xbf16, #tpu.memory_space<vmem>>, vector<4x256xbf16>
    tpu.vector_store %arg12[%c8_67, %c0_68], %108 {strides = array<i32>} : memref<72x256xbf16, #tpu.memory_space<vmem>>, vector<4x256xbf16>,
    %c0_69 = arith.constant 0 : index
    %c127_70 = arith.constant 127 : index
    %110 = vector.load %arg11[%c0_69, %c127_70] : memref<8x512xbf16, #tpu.memory_space<vmem>>, vector<4x256xbf16>
    %c0_i32_71 = arith.constant 0 : i32
    %111 = arith.sitofp %c0_i32_71 : i32 to bf16
    %112 = vector.shape_cast %18 : vector<1x256xi1> to vector<1x256xi1>
    %113 = vector.broadcast %112 : vector<1x256xi1> to vector<4x256xi1>
    %114 = vector.broadcast %111 : bf16 to vector<4x256xbf16>
    %115 = arith.select %113, %110, %114 : vector<4x256xi1>, vector<4x256xbf16>
    %c12 = arith.constant 12 : index
    %c0_72 = arith.constant 0 : index
    %116 = vector.load %arg12[%c12, %c0_72] : memref<72x256xbf16, #tpu.memory_space<vmem>>, vector<4x256xbf16>
    tpu.vector_store %arg12[%c12, %c0_72], %115 {strides = array<i32>} : memref<72x256xbf16, #tpu.memory_space<vmem>>, vector<4x256xbf16>,
    %c0_73 = arith.constant 0 : index
    %c128_74 = arith.constant 128 : index
    %117 = vector.load %arg11[%c0_73, %c128_74] : memref<8x512xbf16, #tpu.memory_space<vmem>>, vector<4x256xbf16>
    %c16_75 = arith.constant 16 : index
    %c0_76 = arith.constant 0 : index
    %118 = vector.load %arg12[%c16_75, %c0_76] : memref<72x256xbf16, #tpu.memory_space<vmem>>, vector<4x256xbf16>
    tpu.vector_store %arg12[%c16_75, %c0_76], %117 {strides = array<i32>} : memref<72x256xbf16, #tpu.memory_space<vmem>>, vector<4x256xbf16>,
    %c0_77 = arith.constant 0 : index
    %c129_78 = arith.constant 129 : index
    %119 = vector.load %arg11[%c0_77, %c129_78] : memref<8x512xbf16, #tpu.memory_space<vmem>>, vector<4x256xbf16>
    %c0_i32_79 = arith.constant 0 : i32
    %120 = arith.sitofp %c0_i32_79 : i32 to bf16
    %121 = vector.shape_cast %20 : vector<1x256xi1> to vector<1x256xi1>
    %122 = vector.broadcast %121 : vector<1x256xi1> to vector<4x256xi1>
    %123 = vector.broadcast %120 : bf16 to vector<4x256xbf16>
    %124 = arith.select %122, %119, %123 : vector<4x256xi1>, vector<4x256xbf16>
    %c20 = arith.constant 20 : index
    %c0_80 = arith.constant 0 : index
    %125 = vector.load %arg12[%c20, %c0_80] : memref<72x256xbf16, #tpu.memory_space<vmem>>, vector<4x256xbf16>
    tpu.vector_store %arg12[%c20, %c0_80], %124 {strides = array<i32>} : memref<72x256xbf16, #tpu.memory_space<vmem>>, vector<4x256xbf16>,
    %c0_81 = arith.constant 0 : index
    %c143_82 = arith.constant 143 : index
    %126 = vector.load %arg11[%c0_81, %c143_82] : memref<8x512xbf16, #tpu.memory_space<vmem>>, vector<4x256xbf16>
    %c0_i32_83 = arith.constant 0 : i32
    %127 = arith.sitofp %c0_i32_83 : i32 to bf16
    %128 = vector.shape_cast %18 : vector<1x256xi1> to vector<1x256xi1>
    %129 = vector.broadcast %128 : vector<1x256xi1> to vector<4x256xi1>
    %130 = vector.broadcast %127 : bf16 to vector<4x256xbf16>
    %131 = arith.select %129, %126, %130 : vector<4x256xi1>, vector<4x256xbf16>
    %c24_84 = arith.constant 24 : index
    %c0_85 = arith.constant 0 : index
    %132 = vector.load %arg12[%c24_84, %c0_85] : memref<72x256xbf16, #tpu.memory_space<vmem>>, vector<4x256xbf16>
    tpu.vector_store %arg12[%c24_84, %c0_85], %131 {strides = array<i32>} : memref<72x256xbf16, #tpu.memory_space<vmem>>, vector<4x256xbf16>,
    %c0_86 = arith.constant 0 : index
    %c144_87 = arith.constant 144 : index
    %133 = vector.load %arg11[%c0_86, %c144_87] : memref<8x512xbf16, #tpu.memory_space<vmem>>, vector<4x256xbf16>
    %c28 = arith.constant 28 : index
    %c0_88 = arith.constant 0 : index
    %134 = vector.load %arg12[%c28, %c0_88] : memref<72x256xbf16, #tpu.memory_space<vmem>>, vector<4x256xbf16>
    tpu.vector_store %arg12[%c28, %c0_88], %133 {strides = array<i32>} : memref<72x256xbf16, #tpu.memory_space<vmem>>, vector<4x256xbf16>,
    %c0_89 = arith.constant 0 : index
    %c145_90 = arith.constant 145 : index
    %135 = vector.load %arg11[%c0_89, %c145_90] : memref<8x512xbf16, #tpu.memory_space<vmem>>, vector<4x256xbf16>
    %c0_i32_91 = arith.constant 0 : i32
    %136 = arith.sitofp %c0_i32_91 : i32 to bf16
    %137 = vector.shape_cast %20 : vector<1x256xi1> to vector<1x256xi1>
    %138 = vector.broadcast %137 : vector<1x256xi1> to vector<4x256xi1>
    %139 = vector.broadcast %136 : bf16 to vector<4x256xbf16>
    %140 = arith.select %138, %135, %139 : vector<4x256xi1>, vector<4x256xbf16>
    %c32_92 = arith.constant 32 : index
    %c0_93 = arith.constant 0 : index
    %141 = vector.load %arg12[%c32_92, %c0_93] : memref<72x256xbf16, #tpu.memory_space<vmem>>, vector<4x256xbf16>
    tpu.vector_store %arg12[%c32_92, %c0_93], %140 {strides = array<i32>} : memref<72x256xbf16, #tpu.memory_space<vmem>>, vector<4x256xbf16>,
    %c0_94 = arith.constant 0 : index
    %c0_95 = arith.constant 0 : index
    %142 = vector.load %arg7[%c0_94, %c0_95] : memref<4x36xbf16, #tpu.memory_space<vmem>>, vector<4x36xbf16>
    %c0_96 = arith.constant 0 : index
    %c0_97 = arith.constant 0 : index
    %143 = vector.load %arg12[%c0_96, %c0_97] : memref<72x256xbf16, #tpu.memory_space<vmem>>, vector<36x256xbf16>
    %cst_98 = arith.constant dense<0.000000e+00> : vector<4x256xf32>
    %144 = tpu.matmul %142, %143, %cst_98 {dimension_numbers = #tpu.dot_dimension_numbers<[1], [0], [0], [1], [0, 0, 1, 1], [], []>} : vector<4x36xbf16>, vector<36x256xbf16>, vector<4x256xf32> -> vector<4x256xf32>
    %c0_99 = arith.constant 0 : index
    %c0_100 = arith.constant 0 : index
    %145 = vector.load %arg8[%c0_99, %c0_100] : memref<4x1xf32, #tpu.memory_space<vmem>>, vector<4x1xf32>
    %146 = vector.broadcast %145 : vector<4x1xf32> to vector<4x256xf32>
    %147 = arith.mulf %144, %146 : vector<4x256xf32>
    %c0_101 = arith.constant 0 : index
    %c0_102 = arith.constant 0 : index
    %148 = vector.load %arg9[%c0_101, %c0_102] : memref<4x1xf32, #tpu.memory_space<vmem>>, vector<4x1xf32>
    %149 = vector.broadcast %148 : vector<4x1xf32> to vector<4x256xf32>
    %150 = arith.addf %147, %149 : vector<4x256xf32>
    %cst_103 = arith.constant 0.000000e+00 : f32
    %151 = vector.broadcast %cst_103 : f32 to vector<4x256xf32>
    %152 = arith.maximumf %150, %151 : vector<4x256xf32>
    %c0_104 = arith.constant 0 : index
    %c0_105 = arith.constant 0 : index
    %c0_106 = arith.constant 0 : index
    %153 = vector.load %arg10[%c0_104, %c0_105, %c0_106] : memref<1x4x256xf32, #tpu.memory_space<vmem>>, vector<1x4x256xf32>
    %154 = vector.shape_cast %153 : vector<1x4x256xf32> to vector<4x256xf32>
    %155 = vector.shape_cast %152 : vector<4x256xf32> to vector<1x4x256xf32>
    tpu.vector_store %arg10[%c0_104, %c0_105, %c0_106], %155 {strides = array<i32>} : memref<1x4x256xf32, #tpu.memory_space<vmem>>, vector<1x4x256xf32>,
    return
  }
  func.func @transform_0(%arg0: i32) -> (i32, i32, i32) {
    %c0_i32 = arith.constant 0 : i32
    %c0_i32_0 = arith.constant 0 : i32
    %c0_i32_1 = arith.constant 0 : i32
    return %arg0, %c0_i32, %c0_i32_0 : i32, i32, i32
  }
  func.func @transform_1(%arg0: i32) -> (i32, i32, i32) {
    %c0_i32 = arith.constant 0 : i32
    %c0_i32_0 = arith.constant 0 : i32
    %c0_i32_1 = arith.constant 0 : i32
    return %arg0, %c0_i32, %c0_i32_0 : i32, i32, i32
  }
  func.func @transform_2(%arg0: i32) -> (i32, i32) {
    %c0_i32 = arith.constant 0 : i32
    %c0_i32_0 = arith.constant 0 : i32
    %c0_i32_1 = arith.constant 0 : i32
    return %c0_i32, %c0_i32_0 : i32, i32
  }
  func.func @transform_3(%arg0: i32) -> (i32, i32) {
    %c0_i32 = arith.constant 0 : i32
    %c0_i32_0 = arith.constant 0 : i32
    %c0_i32_1 = arith.constant 0 : i32
    return %c0_i32, %c0_i32_0 : i32, i32
  }
  func.func @transform_4(%arg0: i32) -> (i32, i32) {
    %c0_i32 = arith.constant 0 : i32
    %c0_i32_0 = arith.constant 0 : i32
    %c0_i32_1 = arith.constant 0 : i32
    return %c0_i32, %c0_i32_0 : i32, i32
  }
  func.func @transform_5(%arg0: i32) -> (i32, i32) {
    %c0_i32 = arith.constant 0 : i32
    %c0_i32_0 = arith.constant 0 : i32
    %c0_i32_1 = arith.constant 0 : i32
    return %c0_i32, %c0_i32_0 : i32, i32
  }
  func.func @transform_6(%arg0: i32) -> (i32, i32) {
    %c0_i32 = arith.constant 0 : i32
    %c0_i32_0 = arith.constant 0 : i32
    %c0_i32_1 = arith.constant 0 : i32
    return %c0_i32, %c0_i32_0 : i32, i32
  }
  func.func @transform_7(%arg0: i32) -> (i32, i32) {
    %c0_i32 = arith.constant 0 : i32
    %c0_i32_0 = arith.constant 0 : i32
    %c0_i32_1 = arith.constant 0 : i32
    return %c0_i32, %c0_i32_0 : i32, i32
  }
  func.func @transform_8(%arg0: i32) -> (i32, i32) {
    %c0_i32 = arith.constant 0 : i32
    %c0_i32_0 = arith.constant 0 : i32
    %c0_i32_1 = arith.constant 0 : i32
    return %c0_i32, %c0_i32_0 : i32, i32
  }
  func.func @transform_9(%arg0: i32) -> (i32, i32, i32) {
    %c0_i32 = arith.constant 0 : i32
    %c0_i32_0 = arith.constant 0 : i32
    %c0_i32_1 = arith.constant 0 : i32
    return %arg0, %c0_i32, %c0_i32_0 : i32, i32, i32
  }
}

</mosaic_0001>

<bundles_post_ra>
// kernel: unet_up_block_forward.1
= control target key start
LH: loop header
LB: loop body
LE: loop exit
PB: predicated region body
PF: predicated region fallthrough
CT: control target
= control target key end

     0   :  { %s1278_s30 = smov 0   ;;  %s1561_s0 = inlined_call_operand.vmem [shape: f32[2,4,64], index: 0, kind: input, shape index: {}]   ;;  %s1562_s1 = inlined_call_operand.vmem [shape: bf16[2,4,256], index: 1, kind: input, shape index: {}]   ;;  %s1563_s2 = inlined_call_operand.vmem [shape: f32[64,256], index: 2, kind: input, shape index: {}]   ;;  %s1564_s3 = inlined_call_operand.vmem [shape: bf16[4,72], index: 3, kind: input, shape index: {}]   ;;  %s1565_s4 = inlined_call_operand.vmem [shape: f32[4,1], index: 4, kind: input, shape index: {}]   ;;  %s1566_s5 = inlined_call_operand.vmem [shape: f32[4,1], index: 5, kind: input, shape index: {}]   ;;  %s1567_s6 = inlined_call_operand.vmem [shape: bf16[4,36], index: 6, kind: input, shape index: {}]   ;;  %s1568_s7 = inlined_call_operand.vmem [shape: f32[4,1], index: 7, kind: input, shape index: {}]   ;;  %s1569_s8 = inlined_call_operand.vmem [shape: f32[4,1], index: 8, kind: input, shape index: {}]   ;;  %s1570_s9 = inlined_call_operand.vmem [shape: f32[2,4,256], index: 9, kind: output, shape index: {}]  }
   0x1 LB: > { %s1125_s10 = sadd.s32 4294967295, %s1216_s30   ;;  %p1129_p0 = scmp.ge.s32.totalorder %s1216_s30, 1  ;;  %s1216_s30 = sphi %s1278_s30, %s19_s30  }
   0x2   : > { %p296_p1 = scmp.lt.s32.totalorder %s1216_s30, 3 }
   0x4   : > { %p297_p2 = pnand %p1129_p0, %p296_p1 }
   0x5   : > { %v390_v0 = vld [vmem:[%s1563_s2 + $0x8] sm:$0xff] (!%p297_p2)  ;;  %v392_v1 = vld [vmem:[%s1563_s2 + $0x18] sm:$0xff] (!%p297_p2)  ;;  %v389_v2 = vld [vmem:[%s1563_s2] sm:$0xff] (!%p297_p2)  ;;  %p1295_p3 = scmp.lt.s32.totalorder (!%p297_p2), %s1125_s10, 1  ;;  %v353_v3 = vlaneseq (!%p297_p2)  ;;  %v1218_v8 = vmov (!%p297_p2), 0.0   ;;  %vm386_vm0 = vcmask (!%p297_p2), 134144  }
   0x6   : > { %300 = sbr.rel (%p297_p2) target bundleno = 1014 (0x3f6), region = 56  ;;  %v1165_v4 = vpack.c.bf16 (!%p297_p2), %v392_v1, %v390_v0  ;;  %v391_v5 = vld [vmem:[%s1563_s2 + $0x10] sm:$0xff] (!%p297_p2)  ;;  %v394_v6 = vld [vmem:[%s1563_s2 + $0x28] sm:$0xff] (!%p297_p2)  ;;  %v396_v7 = vld [vmem:[%s1563_s2 + $0x38] sm:$0xff] (!%p297_p2)  ;;  %473 = vmatprep.mubr.f32.mxu0 (!%p297_p2), %v1218_v8  ;;  %v1219_v15 = vmov (!%p297_p2), 0   ;;  %s1220_s29 = smov (!%p297_p2), 127  }
   0x7   : > { %v1167_v9 = vpack.c.bf16 (!%p297_p2), %v391_v5, %v389_v2  ;;  %v1169_v10 = vpack.c.bf16 (!%p297_p2), %v396_v7, %v394_v6  ;;  %v393_v11 = vld [vmem:[%s1563_s2 + $0x20] sm:$0xff] (!%p297_p2)  ;;  %v395_v12 = vld [vmem:[%s1563_s2 + $0x30] sm:$0xff] (!%p297_p2)  ;;  %v398_v13 = vld [vmem:[%s1563_s2 + $0x48] sm:$0xff] (!%p297_p2)  ;;  %v354_v14 = vand.u32 (!%p297_p2), 127, %v353_v3  ;;  %387 = vst.msk [vmem:[#allocation2 + $0xc] sm:$0xf] (!%p297_p2), %vm386_vm0, %v1219_v15  ;;  %1199 = vset.pattern.permute.xlu0 (!%p297_p2), %v1219_v15  ;;  %782 = vmatprep.mubr.bf16.mxu1 (!%p297_p2), %v1219_v15 }
   0x8   : > { %1166 = vmatprep.subr.bf16.mxu0 (!%p297_p2), %v1165_v4  ;;  %v400_v16 = vld [vmem:[%s1563_s2 + $0x58] sm:$0xff] (!%p297_p2)  ;;  %1200 = vset.pattern.permute.xlu1 (!%p297_p2), %v1219_v15  ;;  %v1171_v17 = vpack.c.bf16 (!%p297_p2), %v395_v12, %v393_v11  ;;  %v397_v21 = vld [vmem:[%s1563_s2 + $0x40] sm:$0xff] (!%p297_p2)  ;;  %v399_v22 = vld [vmem:[%s1563_s2 + $0x50] sm:$0xff] (!%p297_p2)  ;;  %s1221_s15 = smov (!%p297_p2), 111   ;;  %vm405_vm7 = vcmask (!%p297_p2), 523264   ;;  %s1222_s16 = smov (!%p297_p2), 1  }
   0x9   : > { %1168 = vmatpush1.bf16.msra.mxu0 (!%p297_p2), %v1167_v9  ;;  %v355_v18 = vadd.s32 (!%p297_p2), 128, %v354_v14  ;;  %v360_v19 = vand.u32 (!%p297_p2), 15, %v354_v14  ;;  %v1173_v20 = vpack.c.bf16 (!%p297_p2), %v400_v16, %v398_v13  ;;  %v402_v23 = vld [vmem:[%s1563_s2 + $0x68] sm:$0xff] (!%p297_p2)  ;;  %v404_v24 = vld [vmem:[%s1563_s2 + $0x78] sm:$0xff] (!%p297_p2)  ;;  %v1175_v27 = vpack.c.bf16 (!%p297_p2), %v399_v22, %v397_v21  ;;  %v401_v30 = vld [vmem:[%s1563_s2 + $0x60] sm:$0xff] (!%p297_p2)  ;;  %s1223_s17 = smov (!%p297_p2), 113  }
   0xa   : > { %1170 = vmatprep.subr.bf16.mxu0 (!%p297_p2), %v1169_v10  ;;  %v1177_v29 = vpack.c.bf16 (!%p297_p2), %v404_v24, %v402_v23  ;;  %v403_v31 = vld [vmem:[%s1563_s2 + $0x70] sm:$0xff] (!%p297_p2)  ;;  %s1224_s18 = smov (!%p297_p2), 17   ;;  %s1225_s19 = smov (!%p297_p2), 15   ;;  %vm384_vm8 = vcmask (!%p297_p2), 1044344   ;;  %vm597_vm9 = vcmask (!%p297_p2), 7168   ;;  %vm512_vm11 = vcmask (!%p297_p2), 908288  }
   0xb   : > { %v367_v26 = vand.u32 (!%p297_p2), 15, %v355_v18  ;;  %vm380_vm1 = vcmp.ne.s32.totalorder (!%p297_p2), %v360_v19, 0  ;;  %vm1342_vm2 = vcmp.ne.s32.totalorder (!%p297_p2), %v360_v19, 15  ;;  %v1179_v33 = vpack.c.bf16 (!%p297_p2), %v403_v31, %v401_v30  ;;  %385 = vst.msk [vmem:[#allocation2] sm:$0xf] (!%p297_p2), %vm384_vm8, %v1219_v15  ;;  %s1227_s20 = smov (!%p297_p2), 112  }
   0xc   : > { %vm558_vm12 = vcmask (!%p297_p2), 924672   ;;  %vm1574_vm15 = vcmask (!%p297_p2), 1039360   ;;  %v791_v22 = vld [vmem:[%s1565_s4] sm:$0xf] (!%p297_p2) }
   0xd   : > { %s1595_s10 = smov (!%p1295_p3, %s1125_s10), 1  ;;  %1172 = vmatpush1.bf16.msra.mxu0 %v1171_v17  ;;  %vm381_vm3 = vcmp.ne.s32.totalorder %v367_v26, 0  ;;  %vm383_vm4 = vcmp.ne.s32.totalorder %v367_v26, 15 }
   0xe   : > { %s1130_s13 = sshll.u32 %s1595_s10, 2  ;;  %1174 = vmatprep.subr.bf16.mxu0 %v1173_v20  ;;  %vm507_vm5 = vmpackc.low %vm381_vm3, %vm380_vm1  ;;  %v604_v39 = vld [vmem:[#allocation2 + $0xc] sm:$0xf] }
   0xf   : > { %s344_s22 = scalar_lea.vmem %s1562_s1, %s1130_s13  ;;  %v508_v32 = vsel %vm507_vm5, 65537, %v1219_v15  ;;  %vm553_vm6 = vmpackc.low %vm383_vm4, %vm1342_vm2  ;;  %s339_s14 = scalar_lea.vmem %s1561_s0, %s1130_s13  ;;  %v626_v5 = vld [vmem:[#allocation2 + $0xc] sm:$0xf]  ;;  %vm573_vm5 = vcmask 121856  }
  0x10   : > { %v1201_v25 = vld [vmem:[%s344_s22] ss:$0 sps:$4 sm:$0xff]   ;;  %579 = vrot.lane.b32.xlu1 %v508_v32, %s1220_s29  ;;  %509 = vrot.lane.b32.xlu0 %v508_v32, %s1221_s15  ;;  %v554_v34 = vsel %vm553_vm6, 65537, %v1219_v15  ;;  %s1226_s13 = smov 16   ;;  %v648_v13 = vld [vmem:[#allocation2 + $0xc] sm:$0xf] }
  0x11   : > { %1137 = vst.sshfl [vmem:[#allocation2 + $0x4] sm:$0xf0 pattern:$0x76325410] %v1201_v25  ;;  %1176 = vmatpush1.bf16.msra.mxu0 %v1175_v27  ;;  %v388_v35 = vld [vmem:[%s339_s14] sm:$0xf] }
  0x12   : > { %1178 = vmatprep.subr.bf16.mxu0 %v1177_v29  ;;  %v663_v14 = vld [vmem:[#allocation2 + $0xc] sm:$0xf]  ;;  %v799_v27 = vld [vmem:[%s1566_s5] sm:$0xf] }
  0x13   : > { %v887_v21 = vld [vmem:[#allocation2 + $0xc] sm:$0x3] }
  0x14   : > { %605 = vrot.lane.b32.xlu1 %v554_v34, %s1222_s16  ;;  %555 = vrot.lane.b32.xlu0 %v554_v34, %s1223_s17  ;;  %v905_v25 = vld [vmem:[#allocation2 + $0xc] sm:$0x3] }
  0x15   : > { %1180 = vmatpush1.bf16.msra.mxu0 %v1179_v33 }
  0x18   : > { %1135 = vmatmul.mubr.msk.f32.vlgmr.msra.gmra.mrb[0].mxu0 %vm405_vm7, %v388_v35  ;;  %664 = vrot.lane.b32.xlu1 %v554_v34, %s1224_s18  ;;  %vm528_vm7 = vcmask 138240  }
  0x19   : > { %1026 = vmatprep.mubr.bf16.mxu0 %v1219_v15  ;;  %627 = vrot.lane.b32.xlu0 %v508_v32, %s1225_s19 }
  0x82   : > { %v580_v36 = vpop.permute.xlu1 %579  ;;  %v510_v45 = vpop.permute.xlu0 %509 }
  0x83   : > { %v511_v47 = vrot.slane %v510_v45, 4  ;;  %v581_v57 = vrot.slane %v580_v36, 4 }
  0x85   : > { %v1376_v49 = vsel %vm512_vm11, %v511_v47, %v510_v45  ;;  %vm1384_vm14 = vcmp.ne.s16.totalorder %v511_v47, 0  ;;  %v1403_v63 = vsel %vm1574_vm15, %v581_v57, %v580_v36  ;;  %vm1412_vm3 = vcmp.ne.s16.totalorder %v581_v57, 0 }
  0x86   : > { %v606_v37 = vpop.permute.xlu1 %605  ;;  %v556_v48 = vpop.permute.xlu0 %555  ;;  %vm514_vm13 = vcmp.ne.s16.totalorder %v1376_v49, 0  ;;  %vm1571_vm2 = vcmp.ne.s16.totalorder %v1403_v63, 0 }
  0x87   : > { %v607_v38 = vrot.slane %v606_v37, 4  ;;  %v557_v50 = vrot.slane %v556_v48, 4 }
  0x89   : > { %v1366_v40 = vsel %vm597_vm9, %v607_v38, %v606_v37  ;;  %vm1368_vm10 = vcmp.ne.s16.totalorder %v607_v38, 0  ;;  %v1389_v56 = vsel %vm558_vm12, %v557_v50, %v556_v48  ;;  %vm1398_vm1 = vcmp.ne.s16.totalorder %v557_v50, 0 }
  0x8a   : > { %v612_v42 = vsel %vm1368_vm10, %v604_v39, 0  ;;  %vm1572_vm0 = vcmp.ne.s16.totalorder %v1389_v56, 0  ;;  %v665_v9 = vpop.permute.xlu1 %664  ;;  %vm609_vm6 = vcmp.ne.s16.totalorder %v1366_v40, 0  ;;  %v889_v23 = vsel %vm1368_vm10, %v887_v21, 0  ;;  %v1035_v40 = vld [vmem:[%s1568_s7] sm:$0xf] }
  0x8b   : > { %617 = vrot.lane.b32.xlu1 %v612_v42, %s1220_s29  ;;  %v628_v62 = vpop.permute.xlu0 %627  ;;  %v666_v11 = vrot.slane %v665_v9, 4  ;;  %v893_v24 = vrot.slane %v889_v23, 6  ;;  %vm543_vm10 = vcmask 130048  }
  0x8c   : > { %v629_v2 = vrot.slane %v628_v62, 4 }
  0x8d   : > { %vm1435_vm8 = vcmp.ne.s16.totalorder %v666_v11, 0  ;;  %v1446_v17 = vsel %vm528_vm7, %v666_v11, %v665_v9 }
  0x8e   : > { %vm1416_vm4 = vcmp.ne.s16.totalorder %v629_v2, 0  ;;  %v1432_v12 = vsel %vm573_vm5, %v629_v2, %v628_v62  ;;  %v671_v18 = vsel %vm1435_vm8, %v663_v14, 0 }
  0x8f   : > { %v634_v10 = vsel %vm1416_vm4, %v626_v5, 0  ;;  %v907_v26 = vsel %vm1416_vm4, %v905_v25, 0  ;;  %vm658_vm4 = vcmask 916480  }
  0xeb   : > { %v475_v43 = vpop.f32.mrb[0].mxu0 }
  0xec   : > { %v477_v44 = vpop.f32.mrb[1].mxu0 }
  0xed   : > { %v1163_v46 = vpack.c.bf16 %v477_v44, %v475_v43 }
  0xef   : > { %488 = vst [vmem:[#allocation2 + $0x4] sm:$0x33] %v1163_v46 }
  0xf6   : > { %v1378_v51 = vld [vmem:[#allocation2 + $0x4] sm:$0xff] }
  0xf7   : > { %v533_v52 = vld [vmem:[#allocation2 + $0x8] sm:$0xf]  ;;  %v532_v53 = vld [vmem:[#allocation2] sm:$0xff]  ;;  %602 = vst [vmem:[#allocation3 + $0x20] sm:$0xff] %v1378_v51  ;;  %v611_v16 = vsel %vm609_vm6, %v1378_v51, 0 }
  0xf8   : > { %538 = vrot.lane.b32.xlu1 %v533_v52, %s1226_s13  ;;  %536 = vrot.lane.b32.xlu0 %v532_v53, %s1226_s13  ;;  %v502_v54 = vld [vmem:[#allocation2 + $0x8] sm:$0xf]  ;;  %v516_v59 = vsel %vm514_vm13, %v532_v53, 0  ;;  %v562_v1 = vsel %vm1572_vm0, %v532_v53, 0  ;;  %v586_v8 = vsel %vm1571_vm2, %v532_v53, 0  ;;  %vm631_vm2 = vcmp.ne.s16.totalorder %v1432_v12, 0 }
  0xf9   : > { %v517_v58 = vsel %vm1384_vm14, %v502_v54, 0  ;;  %v548_v60 = vld [vmem:[#allocation2 + $0x8] sm:$0xf]  ;;  %v633_v19 = vsel %vm631_vm2, %v1378_v51, 0  ;;  %vm1573_vm0 = vcmp.ne.s16.totalorder %v1446_v17, 0 }
  0xfa   : > { %v563_v0 = vsel %vm1398_vm1, %v548_v60, 0  ;;  %v578_v3 = vld [vmem:[#allocation2 + $0x8] sm:$0xf]  ;;  %v670_v20 = vsel %vm1573_vm0, %v1378_v51, 0  ;;  %vm526_vm0 = vcmask 1043456  }
  0xfb   : > { %v587_v7 = vsel %vm1412_vm3, %v578_v3, 0 }
  0xfc   : > { %522 = vrot.lane.b32.xlu1 %v517_v58, %s1224_s18  ;;  %520 = vrot.lane.b32.xlu0 %v516_v59, %s1224_s18 }
  0xfd   : > { %v618_v28 = vpop.permute.xlu1 %617 }
  0xfe   : > { %v620_v5 = vrot.slane %v618_v28, 4 }
 0x100   : > { %568 = vrot.lane.b32.xlu1 %v563_v0, %s1225_s19  ;;  %566 = vrot.lane.b32.xlu0 %v562_v1, %s1225_s19 }
 0x104   : > { %592 = vrot.lane.b32.xlu1 %v587_v7, %s1222_s16  ;;  %590 = vrot.lane.b32.xlu0 %v586_v8, %s1222_s16 }
 0x108   : > { %639 = vrot.lane.b32.xlu1 %v634_v10, %s1223_s17  ;;  %651 = vrot.lane.b32.xlu0 %v1378_v51, %s1227_s20 }
 0x10c   : > { %653 = vrot.lane.b32.xlu1 %v648_v13, %s1227_s20  ;;  %615 = vrot.lane.b32.xlu0 %v611_v16, %s1220_s29 }
 0x110   : > { %637 = vrot.lane.b32.xlu0 %v633_v19, %s1223_s17  ;;  %676 = vrot.lane.b32.xlu1 %v671_v18, %s1221_s15 }
 0x114   : > { %674 = vrot.lane.b32.xlu0 %v670_v20, %s1221_s15  ;;  %802 = vperm.xlu1 %1200, %v799_v27  }
 0x118   : > { %794 = vperm.xlu0 %1199, %v791_v22  }
 0x11c   : > { %896 = vrot.lane.b32.xlu0 %v893_v24, %s1220_s29 }
 0x120   : > { %912 = vrot.lane.b32.xlu0 %v907_v26, %s1223_s17 }
 0x16a   : > { %v539_v29 = vpop.permute.xlu1 %538  ;;  %v537_v30 = vpop.permute.xlu0 %536 }
 0x16b   : > { %v541_v31 = vrot.slane %v539_v29, 4  ;;  %v540_v32 = vrot.slane %v537_v30, 4 }
 0x16d   : > { %v542_v33 = vsel %vm526_vm0, %v540_v32, %v541_v31 }
 0x16e   : > { %v544_v34 = vsel %vm543_vm10, %v537_v30, %v542_v33  ;;  %v523_v35 = vpop.permute.xlu1 %522  ;;  %v521_v36 = vpop.permute.xlu0 %520  ;;  %v684_v33 = vld [vmem:[%s1564_s3] sm:$0x3] }
 0x16f   : > { %546 = vst [vmem:[#allocation3 + $0x8] sm:$0xff] %v544_v34  ;;  %v525_v37 = vrot.slane %v523_v35, 4  ;;  %v524_v38 = vrot.slane %v521_v36, 4 }
 0x171   : > { %v527_v39 = vsel %vm526_vm0, %v524_v38, %v525_v37 }
 0x172   : > { %v529_v41 = vsel %vm528_vm7, %v521_v36, %v527_v39  ;;  %v569_v42 = vpop.permute.xlu1 %568  ;;  %v567_v43 = vpop.permute.xlu0 %566 }
 0x173   : > { %531 = vst [vmem:[#allocation3] sm:$0xff] %v529_v41  ;;  %v571_v44 = vrot.slane %v569_v42, 4  ;;  %v570_v45 = vrot.slane %v567_v43, 4  ;;  %v1139_v46 = vcombine.high %v529_v41, %v544_v34  ;;  %v1138_v47 = vcombine.low %v529_v41, %v544_v34 }
 0x175   : > { %v572_v48 = vsel %vm526_vm0, %v570_v45, %v571_v44  ;;  %750 = vmatprep.subr.bf16.mxu1 %v1139_v46 }
 0x176   : > { %v574_v50 = vsel %vm573_vm5, %v567_v43, %v572_v48  ;;  %v593_v52 = vpop.permute.xlu1 %592  ;;  %v591_v53 = vpop.permute.xlu0 %590  ;;  %751 = vmatpush1.bf16.msra.mxu1 %v1138_v47 }
 0x177   : > { %576 = vst [vmem:[#allocation3 + $0x10] sm:$0xff] %v574_v50  ;;  %v595_v54 = vrot.slane %v593_v52, 4  ;;  %v594_v57 = vrot.slane %v591_v53, 4 }
 0x179   : > { %v596_v58 = vsel %vm526_vm0, %v594_v57, %v595_v54 }
 0x17a   : > { %v598_v59 = vsel %vm597_vm9, %v591_v53, %v596_v58  ;;  %v640_v60 = vpop.permute.xlu1 %639  ;;  %v652_v62 = vpop.permute.xlu0 %651 }
 0x17b   : > { %600 = vst [vmem:[#allocation3 + $0x18] sm:$0xff] %v598_v59  ;;  %v1141_v0 = vcombine.high %v574_v50, %v598_v59  ;;  %v1140_v1 = vcombine.low %v574_v50, %v598_v59  ;;  %v655_v6 = vrot.slane %v652_v62, 4  ;;  %v642_v18 = vrot.slane %v640_v60, 4 }
 0x17d   : > { %752 = vmatprep.subr.bf16.mxu1 %v1141_v0 }
 0x17e   : > { %v654_v2 = vpop.permute.xlu1 %653  ;;  %v616_v3 = vpop.permute.xlu0 %615  ;;  %753 = vmatpush1.bf16.msra.mxu1 %v1140_v1 }
 0x17f   : > { %v656_v7 = vrot.slane %v654_v2, 4  ;;  %v619_v8 = vrot.slane %v616_v3, 4 }
 0x181   : > { %v657_v9 = vsel %vm526_vm0, %v655_v6, %v656_v7  ;;  %v621_v10 = vsel %vm526_vm0, %v619_v8, %v620_v5 }
 0x182   : > { %v659_v11 = vsel %vm658_vm4, %v652_v62, %v657_v9  ;;  %v622_v13 = vsel %vm1574_vm15, %v616_v3, %v621_v10  ;;  %v638_v14 = vpop.permute.xlu0 %637  ;;  %v677_v16 = vpop.permute.xlu1 %676  ;;  %vm739_vm15 = vcmask 588800   ;;  %v937_v9 = vld [vmem:[#allocation2 + $0xc] sm:$0x3] }
 0x183   : > { %v641_v19 = vrot.slane %v638_v14, 4  ;;  %v1143_v20 = vcombine.high %v1378_v51, %v622_v13  ;;  %v1142_v21 = vcombine.low %v1378_v51, %v622_v13  ;;  %v679_v23 = vrot.slane %v677_v16, 4 }
 0x184   : > { %v939_v13 = vsel %vm1435_vm8, %v937_v9, 0 }
 0x185   : > { %v643_v22 = vsel %vm526_vm0, %v641_v19, %v642_v18  ;;  %754 = vmatprep.subr.bf16.mxu1 %v1143_v20 }
 0x186   : > { %v644_v24 = vsel %vm558_vm12, %v638_v14, %v643_v22  ;;  %v675_v25 = vpop.permute.xlu0 %674  ;;  %755 = vmatpush1.bf16.msra.mxu1 %v1142_v21 }
 0x187   : > { %v678_v26 = vrot.slane %v675_v25, 4  ;;  %v1145_v27 = vcombine.high %v644_v24, %v659_v11  ;;  %v1144_v28 = vcombine.low %v644_v24, %v659_v11 }
 0x189   : > { %v680_v29 = vsel %vm526_vm0, %v678_v26, %v679_v23  ;;  %756 = vmatprep.subr.bf16.mxu1 %v1145_v27 }
 0x18a   : > { %v681_v30 = vsel %vm512_vm11, %v675_v25, %v680_v29  ;;  %757 = vmatpush1.bf16.msra.mxu1 %v1144_v28 }
 0x18b   : > { %v1147_v31 = vcombine.high %v681_v30, %v681_v30  ;;  %v1146_v32 = vcombine.low %v681_v30, %v681_v30 }
 0x18d   : > { %1148 = vmatprep.subr.msk.bf16.mxu1 %vm526_vm0, %v1147_v31  ;;  %v745_v51 = vsel %vm526_vm0, %v1146_v32, 0 }
 0x18e   : > { %759 = vmatpush1.bf16.msra.mxu1 %v745_v51 }
 0x191   : > { %1149 = vmatmul.mubr.msk.bf16.vlgmr.msra.gmra.mrb[0].mxu1 %vm739_vm15, %v684_v33  ;;  %vm1590_vm15 = vcmp.ne.s16.totalorder %v1389_v56, 0  ;;  %v921_v56 = vld [vmem:[#allocation2 + $0xc] sm:$0x3] }
 0x192   : > { %v925_v7 = vrot.slane %v921_v56, 6 }
 0x193   : > { %v803_v36 = vpop.permute.xlu1 %802 }
 0x197   : > { %v795_v34 = vpop.permute.xlu0 %794 }
 0x19b   : > { %v897_v19 = vpop.permute.xlu0 %896 }
 0x19f   : > { %v913_v20 = vpop.permute.xlu0 %912 }
 0x1a0   : > { %v915_v33 = vrot.slane %v913_v20, 4 }
 0x264   : > { %v784_v35 = vpop.f32.mrb[0].mxu1 }
 0x265   : > { %v797_v37 = vmul.f32 %v795_v34, %v784_v35  ;;  %v786_v38 = vpop.f32.mrb[1].mxu1 }
 0x266   : > { %v798_v39 = vmul.f32 %v795_v34, %v786_v38  ;;  %v788_v41 = vpop.f32.mrb[2].mxu1 }
 0x267   : > { %v805_v42 = vadd.f32 %v803_v36, %v797_v37  ;;  %v789_v43 = vpop.f32.mrb[3].mxu1 }
 0x268   : > { %v806_v44 = vadd.f32 %v803_v36, %v798_v39 }
 0x269   : > { %v807_v45 = vmax.f32 %v805_v42, 0.0 }
 0x26a   : > { %v808_v46 = vmax.f32 %v806_v44, 0.0 }
 0x26c   : > { %v1164_v47 = vpack.c.bf16 %v808_v46, %v807_v45 }
 0x26e   : > { %817 = vst [vmem:[#allocation2 + $0x4] sm:$0x33] %v1164_v47 }
 0x275   : > { %v819_v48 = vld [vmem:[#allocation2 + $0x8] sm:$0x3]  ;;  %v818_v50 = vld [vmem:[#allocation2] sm:$0x33] }
 0x276   : > { %v821_v52 = vsel %vm1384_vm14, %v819_v48, 0  ;;  %v820_v53 = vsel %vm514_vm13, %v818_v50, 0  ;;  %v851_v54 = vld [vmem:[#allocation2 + $0x8] sm:$0x3]  ;;  %v850_v57 = vld [vmem:[#allocation2] sm:$0x33] }
 0x277   : > { %826 = vrot.lane.b32.xlu0 %v821_v52, %s1224_s18  ;;  %824 = vrot.lane.b32.xlu1 %v820_v53, %s1224_s18  ;;  %v853_v58 = vsel %vm1398_vm1, %v851_v54, 0  ;;  %v852_v59 = vsel %vm1590_vm15, %v850_v57, 0  ;;  %v835_v60 = vld [vmem:[#allocation2 + $0x8] sm:$0x3]  ;;  %v834_v2 = vld [vmem:[#allocation2] sm:$0x33] }
 0x278   : > { %v904_v55 = vld [vmem:[#allocation2 + $0x4] sm:$0x33]  ;;  %v839_v0 = vrot.slane %v835_v60, 6  ;;  %v838_v5 = vrot.slane %v834_v2, 6  ;;  %vm1591_vm13 = vcmp.ne.s16.totalorder %v1403_v63, 0  ;;  %vm1592_vm14 = vcmp.ne.s16.totalorder %v1446_v17, 0 }
 0x279   : > { %v867_v49 = vld [vmem:[#allocation2 + $0x8] sm:$0x3]  ;;  %v906_v1 = vsel %vm631_vm2, %v904_v55, 0  ;;  %v866_v8 = vld [vmem:[#allocation2] sm:$0x33]  ;;  %v899_v60 = vrot.slane %v897_v19, 4 }
 0x27a   : > { %v884_v62 = vld [vmem:[#allocation2 + $0x4] sm:$0x33]  ;;  %v869_v61 = vsel %vm1412_vm3, %v867_v49, 0  ;;  %v868_v4 = vsel %vm1591_vm13, %v866_v8, 0  ;;  %v1043_v63 = vld [vmem:[%s1569_s8] sm:$0xf] }
 0x27b   : > { %858 = vrot.lane.b32.xlu0 %v853_v58, %s1225_s19  ;;  %856 = vrot.lane.b32.xlu1 %v852_v59, %s1225_s19  ;;  %885 = vst [vmem:[#allocation3 + $0x10] sm:$0x33] %v884_v62  ;;  %v873_v3 = vrot.slane %v869_v61, 6  ;;  %v920_v6 = vld [vmem:[#allocation2 + $0x4] sm:$0x33]  ;;  %v872_v11 = vrot.slane %v868_v4, 6 }
 0x27c   : > { %v924_v12 = vrot.slane %v920_v6, 6  ;;  %v886_v10 = vld [vmem:[#allocation2 + $0x4] sm:$0x33] }
 0x27d   : > { %v888_v14 = vsel %vm609_vm6, %v886_v10, 0  ;;  %v936_v18 = vld [vmem:[#allocation2 + $0x4] sm:$0x33] }
 0x27e   : > { %v892_v16 = vrot.slane %v888_v14, 6  ;;  %v938_v15 = vsel %vm1592_vm14, %v936_v18, 0 }
 0x27f   : > { %842 = vrot.lane.b32.xlu0 %v839_v0, %s1226_s13  ;;  %910 = vrot.lane.b32.xlu1 %v906_v1, %s1223_s17 }
 0x283   : > { %876 = vrot.lane.b32.xlu0 %v873_v3, %s1222_s16  ;;  %840 = vrot.lane.b32.xlu1 %v838_v5, %s1226_s13 }
 0x287   : > { %928 = vrot.lane.b32.xlu0 %v925_v7, %s1227_s20  ;;  %926 = vrot.lane.b32.xlu1 %v924_v12, %s1227_s20 }
 0x28b   : > { %944 = vrot.lane.b32.xlu0 %v939_v13, %s1221_s15  ;;  %874 = vrot.lane.b32.xlu1 %v872_v11, %s1222_s16  ;;  %v952_v11 = vld [vmem:[%s1567_s6] sm:$0x3] }
 0x28f   : > { %1046 = vperm.xlu0 %1199, %v1043_v63   ;;  %894 = vrot.lane.b32.xlu1 %v892_v16, %s1220_s29 }
 0x293   : > { %942 = vrot.lane.b32.xlu1 %v938_v15, %s1221_s15  ;;  %s1162_s15 = sshll.u32 %s1595_s10, 3 }
 0x294   : > { %s349_s18 = scalar_lea.vmem %s1570_s9, %s1162_s15 }
 0x297   : > { %1038 = vperm.xlu1 %1200, %v1035_v40  }
 0x2e9   : > { %v825_v21 = vpop.permute.xlu1 %824  ;;  %v827_v22 = vpop.permute.xlu0 %826 }
 0x2ea   : > { %v828_v23 = vrot.slane %v825_v21, 4  ;;  %v829_v24 = vrot.slane %v827_v22, 4 }
 0x2ec   : > { %v830_v25 = vsel %vm526_vm0, %v828_v23, %v829_v24 }
 0x2ed   : > { %v831_v26 = vsel %vm528_vm7, %v825_v21, %v830_v25  ;;  %v857_v27 = vpop.permute.xlu1 %856  ;;  %v859_v17 = vpop.permute.xlu0 %858 }
 0x2ee   : > { %833 = vst [vmem:[#allocation3] sm:$0x33] %v831_v26  ;;  %v860_v28 = vrot.slane %v857_v27, 4  ;;  %v861_v29 = vrot.slane %v859_v17, 4 }
 0x2f0   : > { %v862_v30 = vsel %vm526_vm0, %v860_v28, %v861_v29 }
 0x2f1   : > { %v863_v31 = vsel %vm573_vm5, %v857_v27, %v862_v30  ;;  %v911_v32 = vpop.permute.xlu1 %910  ;;  %v843_v51 = vpop.permute.xlu0 %842 }
 0x2f2   : > { %865 = vst [vmem:[#allocation3 + $0x8] sm:$0x33] %v863_v31  ;;  %v914_v34 = vrot.slane %v911_v32, 4  ;;  %v845_v39 = vrot.slane %v843_v51, 4 }
 0x2f4   : > { %v916_v35 = vsel %vm526_vm0, %v914_v34, %v915_v33 }
 0x2f5   : > { %v917_v36 = vsel %vm558_vm12, %v911_v32, %v916_v35  ;;  %v841_v37 = vpop.permute.xlu1 %840  ;;  %v877_v38 = vpop.permute.xlu0 %876  ;;  %vm1593_vm12 = vcmask 1039360  }
 0x2f6   : > { %919 = vst [vmem:[#allocation3 + $0x18] sm:$0x33] %v917_v36  ;;  %v844_v41 = vrot.slane %v841_v37, 4  ;;  %v879_v53 = vrot.slane %v877_v38, 4 }
 0x2f8   : > { %v846_v42 = vsel %vm526_vm0, %v844_v41, %v845_v39 }
 0x2f9   : > { %v847_v43 = vsel %vm543_vm10, %v841_v37, %v846_v42  ;;  %v927_v44 = vpop.permute.xlu1 %926  ;;  %v929_v45 = vpop.permute.xlu0 %928 }
 0x2fa   : > { %849 = vst [vmem:[#allocation3] sm:$0xcc] %v847_v43  ;;  %v930_v46 = vrot.slane %v927_v44, 4  ;;  %v931_v47 = vrot.slane %v929_v45, 4 }
 0x2fc   : > { %v932_v48 = vsel %vm526_vm0, %v930_v46, %v931_v47 }
 0x2fd   : > { %v933_v50 = vsel %vm658_vm4, %v927_v44, %v932_v48  ;;  %v875_v52 = vpop.permute.xlu1 %874  ;;  %v945_v49 = vpop.permute.xlu0 %944 }
 0x2fe   : > { %935 = vst [vmem:[#allocation3 + $0x18] sm:$0xcc] %v933_v50  ;;  %v878_v54 = vrot.slane %v875_v52, 4  ;;  %v947_v61 = vrot.slane %v945_v49, 4 }
 0x300   : > { %v880_v57 = vsel %vm526_vm0, %v878_v54, %v879_v53 }
 0x301   : > { %v881_v58 = vsel %vm597_vm9, %v875_v52, %v880_v57  ;;  %v895_v59 = vpop.permute.xlu1 %894  ;;  %vm987_vm9 = vcmask 1041408  }
 0x302   : > { %883 = vst [vmem:[#allocation3 + $0x8] sm:$0xcc] %v881_v58  ;;  %v898_v55 = vrot.slane %v895_v59, 4 }
 0x304   : > { %v900_v62 = vsel %vm526_vm0, %v898_v55, %v899_v60 }
 0x305   : > { %v901_v0 = vsel %vm1593_vm12, %v895_v59, %v900_v62  ;;  %v943_v1 = vpop.permute.xlu1 %942 }
 0x306   : > { %903 = vst [vmem:[#allocation3 + $0x10] sm:$0xcc] %v901_v0  ;;  %v946_v2 = vrot.slane %v943_v1, 4 }
 0x308   : > { %v948_v56 = vsel %vm526_vm0, %v946_v2, %v947_v61 }
 0x309   : > { %v949_v3 = vsel %vm512_vm11, %v943_v1, %v948_v56  ;;  %v1202_v5 = vld [vmem:[#allocation3] ss:$8 sps:$4 sm:$0xff]   ;;  %v1204_v6 = vld [vmem:[#allocation3 + $0x4] ss:$8 sps:$4 sm:$0xff]   ;;  %vm983_vm11 = vcmask 293888  }
 0x30a   : > { %951 = vst [vmem:[#allocation3 + $0x20] sm:$0x33] %v949_v3  ;;  %994 = vmatprep.subr.bf16.mxu0 %v1204_v6 }
 0x30b   : > { %995 = vmatpush1.bf16.msra.mxu0 %v1202_v5 }
 0x30d   : > { %v1205_v7 = vld [vmem:[#allocation3 + $0x10] ss:$8 sps:$4 sm:$0xff]   ;;  %v1207_v8 = vld [vmem:[#allocation3 + $0x14] ss:$8 sps:$4 sm:$0xff]  }
 0x30e   : > { %996 = vmatprep.subr.bf16.mxu0 %v1207_v8  ;;  %v1047_v18 = vpop.permute.xlu0 %1046 }
 0x30f   : > { %997 = vmatpush1.bf16.msra.mxu0 %v1205_v7 }
 0x311   : > { %v957_v12 = vld [vmem:[#allocation3 + $0x20] sm:$0x33] }
 0x312   : > { %v1156_v4 = vcombine.high %v957_v12, %v957_v12  ;;  %v1155_v9 = vcombine.low %v957_v12, %v957_v12 }
 0x314   : > { %1157 = vmatprep.subr.msk.bf16.mxu0 %vm987_vm9, %v1156_v4  ;;  %v989_v10 = vsel %vm987_vm9, %v1155_v9, 0 }
 0x315   : > { %999 = vmatpush1.bf16.msra.mxu0 %v989_v10 }
 0x316   : > { %v1039_v13 = vpop.permute.xlu1 %1038 }
 0x318   : > { %1158 = vmatmul.mubr.msk.bf16.vlgmr.msra.gmra.mrb[4].mxu0 %vm983_vm11, %v952_v11 }
 0x3eb   : > { %v1028_v14 = vpop.f32.mrb[4].mxu0 }
 0x3ec   : > { %v1041_v63 = vmul.f32 %v1039_v13, %v1028_v14  ;;  %v1030_v16 = vpop.f32.mrb[5].mxu0 }
 0x3ed   : > { %v1042_v15 = vmul.f32 %v1039_v13, %v1030_v16  ;;  %v1032_v40 = vpop.f32.mrb[6].mxu0 }
 0x3ee   : > { %v1049_v19 = vadd.f32 %v1047_v18, %v1041_v63  ;;  %v1033_v20 = vpop.f32.mrb[7].mxu0 }
 0x3ef   : > { %v1050_v21 = vadd.f32 %v1047_v18, %v1042_v15 }
 0x3f0   : > { %v1051_v22 = vmax.f32 %v1049_v19, 0.0 }
 0x3f1   : > { %v1052_v23 = vmax.f32 %v1050_v21, 0.0 }
 0x3f3   : > { %v1055_v24 = vcombine.low %v1051_v22, %v1052_v23 }
 0x3f5   : > { %1057 = vst [vmem:[%s349_s18] sm:$0xff] %v1055_v24 }
 0x3f6 PF: > { %s19_s30 = sadd.s32 1, %s1216_s30  }
 0x3f7   : > { %p16_p4 = scmp.ge.s32.totalorder %s19_s30, 4  }
 0x3f9   :  { %18 = sbr.rel (!%p16_p4) target bundleno = 1 (0x1), region = 89 }

</bundles_post_ra>
